<compile_context>
chip_gen: v7x
topology: tpu7x:2x2x1
jax: 0.10.0
libtpu: 0.0.40
codegen_flags: <defaults>
</compile_context>

<pallas_src>
import jax
import jax.numpy as jnp
from jax import lax
from jax.experimental import pallas as pl
from jax.experimental.pallas import tpu as pltpu


def _decoder_kernel(x_ref, mem_ref,
                    wqkv_s_ref, wo_s_ref,
                    wq_c_ref, wkv_c_ref, wo_c_ref,
                    w1_ref, b1_ref, w2_ref, b2_ref,
                    gamma_ref, beta_ref,
                    o_ref,
                    x_acc):
    l = pl.program_id(0)
    n_layers = pl.num_programs(0)

    B, T, C = x_ref.shape
    S = mem_ref.shape[1]
    BT = B * T

    # ---- init residual-stream accumulator on the first layer ----
    @pl.when(l == 0)
    def _():
        x_acc[...] = x_ref[...].astype(jnp.float32).reshape(BT, C)

    def mm(a, b):  # bf16 x bf16 -> f32 accumulation on the MXU
        return jnp.dot(a, b, preferred_element_type=jnp.float32)

    def softmax_attend(q, k, v):
        # q: (B, T, C) bf16, k/v: (B, L, C) bf16 -> (BT, C) f32
        s = jnp.einsum('btd,bsd->bts', q, k,
                       preferred_element_type=jnp.float32)
        s = s - jnp.max(s, axis=-1, keepdims=True)
        p = jnp.exp(s)
        p = p * pl.reciprocal(jnp.sum(p, axis=-1, keepdims=True), approx=True)
        o = jnp.einsum('bts,bsd->btd', p.astype(jnp.bfloat16), v,
                       preferred_element_type=jnp.float32)
        return o.reshape(BT, C)

    # ---- self attention (fused QKV projection; score scale folded into wq) --
    xb = x_acc[...].astype(jnp.bfloat16)                        # (BT, C)
    qkv = mm(xb, wqkv_s_ref[...])                               # (BT, 3C) f32
    q = qkv[:, :C].reshape(B, T, C).astype(jnp.bfloat16)
    k = qkv[:, C:2 * C].reshape(B, T, C).astype(jnp.bfloat16)
    v = qkv[:, 2 * C:].reshape(B, T, C).astype(jnp.bfloat16)
    o = softmax_attend(q, k, v)
    x_acc[...] += mm(o.astype(jnp.bfloat16), wo_s_ref[...])

    # ---- cross attention to memory (fused KV projection) ----
    xb = x_acc[...].astype(jnp.bfloat16)
    memb = mem_ref[...].reshape(B * S, C)                       # bf16
    q = mm(xb, wq_c_ref[...]).reshape(B, T, C).astype(jnp.bfloat16)
    kv = mm(memb, wkv_c_ref[...])                               # (B*S, 2C) f32
    k = kv[:, :C].reshape(B, S, C).astype(jnp.bfloat16)
    v = kv[:, C:].reshape(B, S, C).astype(jnp.bfloat16)
    o = softmax_attend(q, k, v)
    x_acc[...] += mm(o.astype(jnp.bfloat16), wo_c_ref[...])

    # ---- position-wise feed-forward ----
    xb = x_acc[...].astype(jnp.bfloat16)
    h = mm(xb, w1_ref[...]) + b1_ref[...]                       # (BT, F) f32
    h = jnp.maximum(h, 0.0)
    f = mm(h.astype(jnp.bfloat16), w2_ref[...]) + b2_ref[...]   # (BT, C) f32
    x_acc[...] += f

    # ---- final BatchNorm1d over channels (one-pass batch stats) + output ----
    @pl.when(l == n_layers - 1)
    def _():
        xf = x_acc[...]                                         # (BT, C) f32
        n = jnp.float32(BT)
        mean = jnp.sum(xf, axis=0, keepdims=True) / n
        var = jnp.sum(xf * xf, axis=0, keepdims=True) / n - mean * mean
        inv = lax.rsqrt(var + 1e-5)
        y = (xf - mean) * inv * gamma_ref[...] + beta_ref[...]
        o_ref[...] = y.reshape(B, T, C).astype(o_ref.dtype)


def decoder_forward(x, memory, pointcloud, params, n_layers):
    del pointcloud  # see TODO(synk) at top of file
    B, T, C = x.shape
    S = memory.shape[1]
    F = params['w1'].shape[-1]

    x = x.astype(jnp.bfloat16)
    memory = memory.astype(jnp.bfloat16)

    inputs = (x, memory,
              params['wqkv_s'], params['wo_s'],
              params['wq_c'], params['wkv_c'], params['wo_c'],
              params['w1'], params['b1'], params['w2'], params['b2'],
              params['gamma'], params['beta'])

    grid_spec = pltpu.PrefetchScalarGridSpec(
        num_scalar_prefetch=0,
        grid=(n_layers,),
        in_specs=[
            pl.BlockSpec((B, T, C), lambda l: (0, 0, 0)),         # x (resident)
            pl.BlockSpec((B, S, C), lambda l: (0, 0, 0)),         # memory (resident)
            pl.BlockSpec((None, C, 3 * C), lambda l: (l, 0, 0)),  # wqkv_s
            pl.BlockSpec((None, C, C),     lambda l: (l, 0, 0)),  # wo_s
            pl.BlockSpec((None, C, C),     lambda l: (l, 0, 0)),  # wq_c
            pl.BlockSpec((None, C, 2 * C), lambda l: (l, 0, 0)),  # wkv_c
            pl.BlockSpec((None, C, C),     lambda l: (l, 0, 0)),  # wo_c
            pl.BlockSpec((None, C, F),     lambda l: (l, 0, 0)),  # w1
            pl.BlockSpec((None, 1, F),     lambda l: (l, 0, 0)),  # b1
            pl.BlockSpec((None, F, C),     lambda l: (l, 0, 0)),  # w2
            pl.BlockSpec((None, 1, C),     lambda l: (l, 0, 0)),  # b2
            pl.BlockSpec((1, C), lambda l: (0, 0)),               # gamma
            pl.BlockSpec((1, C), lambda l: (0, 0)),               # beta
        ],
        out_specs=pl.BlockSpec((B, T, C), lambda l: (0, 0, 0)),
        scratch_shapes=[pltpu.VMEM((B * T, C), jnp.float32)],     # residual stream
    )

    # TODO(synk): a second "parallel" axis over batch/T-tiles would engage both
    # v7x TensorCores, but the final BatchNorm couples all B*T rows; left as a
    # single-core pipeline at these tiny sizes.
    return pl.pallas_call(
        _decoder_kernel,
        out_shape=jax.ShapeDtypeStruct((B, T, C), jnp.float32),
        grid_spec=grid_spec,
        compiler_params=pltpu.CompilerParams(
            dimension_semantics=("arbitrary",)),
    )(*inputs)


def init_params(key, n_layers, d_model, d_ff):
    ks = jax.random.split(key, 10)
    s_in = 1.0 / jnp.sqrt(jnp.float32(d_model))
    s_ff = 1.0 / jnp.sqrt(jnp.float32(d_ff))
    scale = 1.0 / jnp.sqrt(jnp.float32(d_model))  # attention score scale

    def w(k, shape, sc):
        return jax.random.normal(k, shape, jnp.float32) * sc

    wq_s = w(ks[0], (n_layers, d_model, d_model), s_in) * scale  # scale folded
    wk_s = w(ks[1], (n_layers, d_model, d_model), s_in)
    wv_s = w(ks[2], (n_layers, d_model, d_model), s_in)
    wo_s = w(ks[3], (n_layers, d_model, d_model), s_in)
    wq_c = w(ks[4], (n_layers, d_model, d_model), s_in) * scale  # scale folded
    wk_c = w(ks[5], (n_layers, d_model, d_model), s_in)
    wv_c = w(ks[6], (n_layers, d_model, d_model), s_in)
    wo_c = w(ks[7], (n_layers, d_model, d_model), s_in)
    w1 = w(ks[8], (n_layers, d_model, d_ff), s_in)
    w2 = w(ks[9], (n_layers, d_ff, d_model), s_ff)

    bf = jnp.bfloat16
    return {
        # fused Q/K/V for self-attention, fused K/V for cross-attention
        'wqkv_s': jnp.concatenate([wq_s, wk_s, wv_s], axis=-1).astype(bf),
        'wo_s':   wo_s.astype(bf),
        'wq_c':   wq_c.astype(bf),
        'wkv_c':  jnp.concatenate([wk_c, wv_c], axis=-1).astype(bf),
        'wo_c':   wo_c.astype(bf),
        'w1':     w1.astype(bf),
        'b1':     jnp.zeros((n_layers, 1, d_ff), jnp.float32),
        'w2':     w2.astype(bf),
        'b2':     jnp.zeros((n_layers, 1, d_model), jnp.float32),
        # BatchNorm1d defaults: gamma=1, beta=0
        'gamma':  jnp.ones((1, d_model), jnp.float32),
        'beta':   jnp.zeros((1, d_model), jnp.float32),
    }


if __name__ == "__main__":
    B, T, S, C = 2, 8, 8, 32   # batch, tgt seq, memory seq, d_model (layer.size)
    N_LAYERS = 2
    D_FF = 4 * C

    key = jax.random.PRNGKey(0)
    kx, km, kp, kw = jax.random.split(key, 4)
    x = jax.random.normal(kx, (B, T, C), jnp.float32)
    memory = jax.random.normal(km, (B, S, C), jnp.float32)
    pointcloud = jax.random.normal(kp, (B, 3, 16), jnp.float32)

    params = init_params(kw, N_LAYERS, C, D_FF)

    out = decoder_forward(x, memory, pointcloud, params, N_LAYERS)
    out = jax.block_until_ready(out)
    assert out.shape == (B, T, C)
    print("KERNEL_OK")
</pallas_src>

<mosaic_0001>
module attributes {stable_mosaic.version = 11 : i64} {
  func.func @_decoder_kernel(%arg0: i32, %arg1: memref<2x8x32xbf16, #tpu.memory_space<vmem>>, %arg2: memref<2x8x32xbf16, #tpu.memory_space<vmem>>, %arg3: memref<1x32x96xbf16, #tpu.memory_space<vmem>>, %arg4: memref<1x32x32xbf16, #tpu.memory_space<vmem>>, %arg5: memref<1x32x32xbf16, #tpu.memory_space<vmem>>, %arg6: memref<1x32x64xbf16, #tpu.memory_space<vmem>>, %arg7: memref<1x32x32xbf16, #tpu.memory_space<vmem>>, %arg8: memref<1x32x128xbf16, #tpu.memory_space<vmem>>, %arg9: memref<1x1x128xf32, #tpu.memory_space<vmem>>, %arg10: memref<1x128x32xbf16, #tpu.memory_space<vmem>>, %arg11: memref<1x1x32xf32, #tpu.memory_space<vmem>>, %arg12: memref<1x32xf32, #tpu.memory_space<vmem>>, %arg13: memref<1x32xf32, #tpu.memory_space<vmem>>, %arg14: memref<2x8x32xf32, #tpu.memory_space<vmem>>, %arg15: memref<16x32xf32, #tpu.memory_space<vmem>>) attributes {dimension_semantics = [#tpu.dimension_semantics<arbitrary>], iteration_bounds = array<i64: 2>, scalar_prefetch = 0 : i64, scratch_operands = 1 : i64, tpu.core_type = #tpu.core_type<tc>, window_params = [{pipeline_mode = #tpu.pipeline_mode<synchronous>, transform_indices = @transform_0, window_bounds = array<i64: 2, 8, 32>}, {pipeline_mode = #tpu.pipeline_mode<synchronous>, transform_indices = @transform_1, window_bounds = array<i64: 2, 8, 32>}, {transform_indices = @transform_2, window_bounds = array<i64: 1, 32, 96>}, {transform_indices = @transform_3, window_bounds = array<i64: 1, 32, 32>}, {transform_indices = @transform_4, window_bounds = array<i64: 1, 32, 32>}, {transform_indices = @transform_5, window_bounds = array<i64: 1, 32, 64>}, {transform_indices = @transform_6, window_bounds = array<i64: 1, 32, 32>}, {transform_indices = @transform_7, window_bounds = array<i64: 1, 32, 128>}, {transform_indices = @transform_8, window_bounds = array<i64: 1, 1, 128>}, {transform_indices = @transform_9, window_bounds = array<i64: 1, 128, 32>}, {transform_indices = @transform_10, window_bounds = array<i64: 1, 1, 32>}, {pipeline_mode = #tpu.pipeline_mode<synchronous>, transform_indices = @transform_11, window_bounds = array<i64: 1, 32>}, {pipeline_mode = #tpu.pipeline_mode<synchronous>, transform_indices = @transform_12, window_bounds = array<i64: 1, 32>}, {pipeline_mode = #tpu.pipeline_mode<synchronous>, transform_indices = @transform_13, window_bounds = array<i64: 2, 8, 32>}]} {
    %c0_i32 = arith.constant 0 : i32
    %0 = arith.cmpi eq, %arg0, %c0_i32 : i32
    %1 = arith.extui %0 : i1 to i32
    %c0_i32_0 = arith.constant 0 : i32
    %2 = arith.cmpi ne, %1, %c0_i32_0 : i32
    scf.if %2 {
      %c0_64 = arith.constant 0 : index
      %c0_65 = arith.constant 0 : index
      %c0_66 = arith.constant 0 : index
      %102 = vector.load %arg1[%c0_64, %c0_65, %c0_66] : memref<2x8x32xbf16, #tpu.memory_space<vmem>>, vector<2x8x32xbf16>
      %103 = arith.extf %102 : vector<2x8x32xbf16> to vector<2x8x32xf32>
      %104 = vector.shape_cast %103 : vector<2x8x32xf32> to vector<16x32xf32>
      %c0_67 = arith.constant 0 : index
      %c0_68 = arith.constant 0 : index
      %105 = vector.load %arg15[%c0_67, %c0_68] : memref<16x32xf32, #tpu.memory_space<vmem>>, vector<16x32xf32>
      tpu.vector_store %arg15[%c0_67, %c0_68], %104 {strides = array<i32>} : memref<16x32xf32, #tpu.memory_space<vmem>>, vector<16x32xf32>,
    } else {
    }
    %c0 = arith.constant 0 : index
    %c0_1 = arith.constant 0 : index
    %3 = vector.load %arg15[%c0, %c0_1] : memref<16x32xf32, #tpu.memory_space<vmem>>, vector<16x32xf32>
    %4 = arith.truncf %3 : vector<16x32xf32> to vector<16x32xbf16>
    %c0_2 = arith.constant 0 : index
    %c0_3 = arith.constant 0 : index
    %c0_4 = arith.constant 0 : index
    %5 = vector.load %arg3[%c0_2, %c0_3, %c0_4] : memref<1x32x96xbf16, #tpu.memory_space<vmem>>, vector<1x32x96xbf16>
    %6 = vector.shape_cast %5 : vector<1x32x96xbf16> to vector<32x96xbf16>
    %cst = arith.constant dense<0.000000e+00> : vector<16x96xf32>
    %7 = tpu.matmul %4, %6, %cst {dimension_numbers = #tpu.dot_dimension_numbers<[1], [0], [0], [1], [0, 0, 1, 1], [], []>} : vector<16x32xbf16>, vector<32x96xbf16>, vector<16x96xf32> -> vector<16x96xf32>
    %8 = vector.extract_strided_slice %7 {offsets = [0, 0], sizes = [16, 32], strides = [1, 1]} : vector<16x96xf32> to vector<16x32xf32>
    %9 = vector.shape_cast %8 : vector<16x32xf32> to vector<2x8x32xf32>
    %10 = arith.truncf %9 : vector<2x8x32xf32> to vector<2x8x32xbf16>
    %11 = vector.extract_strided_slice %7 {offsets = [0, 32], sizes = [16, 32], strides = [1, 1]} : vector<16x96xf32> to vector<16x32xf32>
    %12 = vector.shape_cast %11 : vector<16x32xf32> to vector<2x8x32xf32>
    %13 = arith.truncf %12 : vector<2x8x32xf32> to vector<2x8x32xbf16>
    %14 = vector.extract_strided_slice %7 {offsets = [0, 64], sizes = [16, 32], strides = [1, 1]} : vector<16x96xf32> to vector<16x32xf32>
    %15 = vector.shape_cast %14 : vector<16x32xf32> to vector<2x8x32xf32>
    %16 = arith.truncf %15 : vector<2x8x32xf32> to vector<2x8x32xbf16>
    "tpu.trace_start"() <{level = 10 : i32, message = "btd,bsd->bts"}> : () -> ()
    %cst_5 = arith.constant dense<0.000000e+00> : vector<2x8x8xf32>
    %17 = tpu.matmul %10, %13, %cst_5 {dimension_numbers = #tpu.dot_dimension_numbers<[2], [2], [1], [1], [0, 0, 0, 1, 1, 1], [0], [0]>} : vector<2x8x32xbf16>, vector<2x8x32xbf16>, vector<2x8x8xf32> -> vector<2x8x8xf32>
    "tpu.trace_stop"() : () -> ()
    %cst_6 = arith.constant dense<0xFF800000> : vector<2x8xf32>
    %18 = vector.multi_reduction <maximumf>, %17, %cst_6 [2] : vector<2x8x8xf32> to vector<2x8xf32>
    %19 = vector.shape_cast %18 : vector<2x8xf32> to vector<2x8x1xf32>
    %20 = vector.broadcast %19 : vector<2x8x1xf32> to vector<2x8x8xf32>
    %21 = arith.subf %17, %20 : vector<2x8x8xf32>
    %22 = math.exp %21 : vector<2x8x8xf32>
    %cst_7 = arith.constant dense<0.000000e+00> : vector<2x8xf32>
    %23 = vector.multi_reduction <add>, %22, %cst_7 [2] : vector<2x8x8xf32> to vector<2x8xf32>
    %24 = vector.shape_cast %23 : vector<2x8xf32> to vector<2x8x1xf32>
    %25 = tpu.reciprocal %24 {approx = true} : vector<2x8x1xf32> -> vector<2x8x1xf32>
    %26 = vector.broadcast %25 : vector<2x8x1xf32> to vector<2x8x8xf32>
    %27 = arith.mulf %22, %26 : vector<2x8x8xf32>
    %28 = arith.truncf %27 : vector<2x8x8xf32> to vector<2x8x8xbf16>
    "tpu.trace_start"() <{level = 10 : i32, message = "bts,bsd->btd"}> : () -> ()
    %cst_8 = arith.constant dense<0.000000e+00> : vector<2x8x32xf32>
    %29 = tpu.matmul %28, %16, %cst_8 {dimension_numbers = #tpu.dot_dimension_numbers<[2], [1], [1], [2], [0, 0, 0, 1, 1, 2], [0], [0]>} : vector<2x8x8xbf16>, vector<2x8x32xbf16>, vector<2x8x32xf32> -> vector<2x8x32xf32>
    "tpu.trace_stop"() : () -> ()
    %30 = vector.shape_cast %29 : vector<2x8x32xf32> to vector<16x32xf32>
    %c0_9 = arith.constant 0 : index
    %c0_10 = arith.constant 0 : index
    %31 = vector.load %arg15[%c0_9, %c0_10] : memref<16x32xf32, #tpu.memory_space<vmem>>, vector<16x32xf32>
    %32 = arith.truncf %30 : vector<16x32xf32> to vector<16x32xbf16>
    %c0_11 = arith.constant 0 : index
    %c0_12 = arith.constant 0 : index
    %c0_13 = arith.constant 0 : index
    %33 = vector.load %arg4[%c0_11, %c0_12, %c0_13] : memref<1x32x32xbf16, #tpu.memory_space<vmem>>, vector<1x32x32xbf16>
    %34 = vector.shape_cast %33 : vector<1x32x32xbf16> to vector<32x32xbf16>
    %cst_14 = arith.constant dense<0.000000e+00> : vector<16x32xf32>
    %35 = tpu.matmul %32, %34, %cst_14 {dimension_numbers = #tpu.dot_dimension_numbers<[1], [0], [0], [1], [0, 0, 1, 1], [], []>} : vector<16x32xbf16>, vector<32x32xbf16>, vector<16x32xf32> -> vector<16x32xf32>
    %36 = arith.addf %31, %35 : vector<16x32xf32>
    %c0_15 = arith.constant 0 : index
    %c0_16 = arith.constant 0 : index
    %37 = vector.load %arg15[%c0_15, %c0_16] : memref<16x32xf32, #tpu.memory_space<vmem>>, vector<16x32xf32>
    tpu.vector_store %arg15[%c0_15, %c0_16], %36 {strides = array<i32>} : memref<16x32xf32, #tpu.memory_space<vmem>>, vector<16x32xf32>,
    %c0_17 = arith.constant 0 : index
    %c0_18 = arith.constant 0 : index
    %38 = vector.load %arg15[%c0_17, %c0_18] : memref<16x32xf32, #tpu.memory_space<vmem>>, vector<16x32xf32>
    %39 = arith.truncf %38 : vector<16x32xf32> to vector<16x32xbf16>
    %c0_19 = arith.constant 0 : index
    %c0_20 = arith.constant 0 : index
    %c0_21 = arith.constant 0 : index
    %40 = vector.load %arg2[%c0_19, %c0_20, %c0_21] : memref<2x8x32xbf16, #tpu.memory_space<vmem>>, vector<2x8x32xbf16>
    %41 = vector.shape_cast %40 : vector<2x8x32xbf16> to vector<16x32xbf16>
    %c0_22 = arith.constant 0 : index
    %c0_23 = arith.constant 0 : index
    %c0_24 = arith.constant 0 : index
    %42 = vector.load %arg5[%c0_22, %c0_23, %c0_24] : memref<1x32x32xbf16, #tpu.memory_space<vmem>>, vector<1x32x32xbf16>
    %43 = vector.shape_cast %42 : vector<1x32x32xbf16> to vector<32x32xbf16>
    %cst_25 = arith.constant dense<0.000000e+00> : vector<16x32xf32>
    %44 = tpu.matmul %39, %43, %cst_25 {dimension_numbers = #tpu.dot_dimension_numbers<[1], [0], [0], [1], [0, 0, 1, 1], [], []>} : vector<16x32xbf16>, vector<32x32xbf16>, vector<16x32xf32> -> vector<16x32xf32>
    %45 = vector.shape_cast %44 : vector<16x32xf32> to vector<2x8x32xf32>
    %46 = arith.truncf %45 : vector<2x8x32xf32> to vector<2x8x32xbf16>
    %c0_26 = arith.constant 0 : index
    %c0_27 = arith.constant 0 : index
    %c0_28 = arith.constant 0 : index
    %47 = vector.load %arg6[%c0_26, %c0_27, %c0_28] : memref<1x32x64xbf16, #tpu.memory_space<vmem>>, vector<1x32x64xbf16>
    %48 = vector.shape_cast %47 : vector<1x32x64xbf16> to vector<32x64xbf16>
    %cst_29 = arith.constant dense<0.000000e+00> : vector<16x64xf32>
    %49 = tpu.matmul %41, %48, %cst_29 {dimension_numbers = #tpu.dot_dimension_numbers<[1], [0], [0], [1], [0, 0, 1, 1], [], []>} : vector<16x32xbf16>, vector<32x64xbf16>, vector<16x64xf32> -> vector<16x64xf32>
    %50 = vector.extract_strided_slice %49 {offsets = [0, 0], sizes = [16, 32], strides = [1, 1]} : vector<16x64xf32> to vector<16x32xf32>
    %51 = vector.shape_cast %50 : vector<16x32xf32> to vector<2x8x32xf32>
    %52 = arith.truncf %51 : vector<2x8x32xf32> to vector<2x8x32xbf16>
    %53 = vector.extract_strided_slice %49 {offsets = [0, 32], sizes = [16, 32], strides = [1, 1]} : vector<16x64xf32> to vector<16x32xf32>
    %54 = vector.shape_cast %53 : vector<16x32xf32> to vector<2x8x32xf32>
    %55 = arith.truncf %54 : vector<2x8x32xf32> to vector<2x8x32xbf16>
    "tpu.trace_start"() <{level = 10 : i32, message = "btd,bsd->bts"}> : () -> ()
    %cst_30 = arith.constant dense<0.000000e+00> : vector<2x8x8xf32>
    %56 = tpu.matmul %46, %52, %cst_30 {dimension_numbers = #tpu.dot_dimension_numbers<[2], [2], [1], [1], [0, 0, 0, 1, 1, 1], [0], [0]>} : vector<2x8x32xbf16>, vector<2x8x32xbf16>, vector<2x8x8xf32> -> vector<2x8x8xf32>
    "tpu.trace_stop"() : () -> ()
    %cst_31 = arith.constant dense<0xFF800000> : vector<2x8xf32>
    %57 = vector.multi_reduction <maximumf>, %56, %cst_31 [2] : vector<2x8x8xf32> to vector<2x8xf32>
    %58 = vector.shape_cast %57 : vector<2x8xf32> to vector<2x8x1xf32>
    %59 = vector.broadcast %58 : vector<2x8x1xf32> to vector<2x8x8xf32>
    %60 = arith.subf %56, %59 : vector<2x8x8xf32>
    %61 = math.exp %60 : vector<2x8x8xf32>
    %cst_32 = arith.constant dense<0.000000e+00> : vector<2x8xf32>
    %62 = vector.multi_reduction <add>, %61, %cst_32 [2] : vector<2x8x8xf32> to vector<2x8xf32>
    %63 = vector.shape_cast %62 : vector<2x8xf32> to vector<2x8x1xf32>
    %64 = tpu.reciprocal %63 {approx = true} : vector<2x8x1xf32> -> vector<2x8x1xf32>
    %65 = vector.broadcast %64 : vector<2x8x1xf32> to vector<2x8x8xf32>
    %66 = arith.mulf %61, %65 : vector<2x8x8xf32>
    %67 = arith.truncf %66 : vector<2x8x8xf32> to vector<2x8x8xbf16>
    "tpu.trace_start"() <{level = 10 : i32, message = "bts,bsd->btd"}> : () -> ()
    %cst_33 = arith.constant dense<0.000000e+00> : vector<2x8x32xf32>
    %68 = tpu.matmul %67, %55, %cst_33 {dimension_numbers = #tpu.dot_dimension_numbers<[2], [1], [1], [2], [0, 0, 0, 1, 1, 2], [0], [0]>} : vector<2x8x8xbf16>, vector<2x8x32xbf16>, vector<2x8x32xf32> -> vector<2x8x32xf32>
    "tpu.trace_stop"() : () -> ()
    %69 = vector.shape_cast %68 : vector<2x8x32xf32> to vector<16x32xf32>
    %c0_34 = arith.constant 0 : index
    %c0_35 = arith.constant 0 : index
    %70 = vector.load %arg15[%c0_34, %c0_35] : memref<16x32xf32, #tpu.memory_space<vmem>>, vector<16x32xf32>
    %71 = arith.truncf %69 : vector<16x32xf32> to vector<16x32xbf16>
    %c0_36 = arith.constant 0 : index
    %c0_37 = arith.constant 0 : index
    %c0_38 = arith.constant 0 : index
    %72 = vector.load %arg7[%c0_36, %c0_37, %c0_38] : memref<1x32x32xbf16, #tpu.memory_space<vmem>>, vector<1x32x32xbf16>
    %73 = vector.shape_cast %72 : vector<1x32x32xbf16> to vector<32x32xbf16>
    %cst_39 = arith.constant dense<0.000000e+00> : vector<16x32xf32>
    %74 = tpu.matmul %71, %73, %cst_39 {dimension_numbers = #tpu.dot_dimension_numbers<[1], [0], [0], [1], [0, 0, 1, 1], [], []>} : vector<16x32xbf16>, vector<32x32xbf16>, vector<16x32xf32> -> vector<16x32xf32>
    %75 = arith.addf %70, %74 : vector<16x32xf32>
    %c0_40 = arith.constant 0 : index
    %c0_41 = arith.constant 0 : index
    %76 = vector.load %arg15[%c0_40, %c0_41] : memref<16x32xf32, #tpu.memory_space<vmem>>, vector<16x32xf32>
    tpu.vector_store %arg15[%c0_40, %c0_41], %75 {strides = array<i32>} : memref<16x32xf32, #tpu.memory_space<vmem>>, vector<16x32xf32>,
    %c0_42 = arith.constant 0 : index
    %c0_43 = arith.constant 0 : index
    %77 = vector.load %arg15[%c0_42, %c0_43] : memref<16x32xf32, #tpu.memory_space<vmem>>, vector<16x32xf32>
    %78 = arith.truncf %77 : vector<16x32xf32> to vector<16x32xbf16>
    %c0_44 = arith.constant 0 : index
    %c0_45 = arith.constant 0 : index
    %c0_46 = arith.constant 0 : index
    %79 = vector.load %arg8[%c0_44, %c0_45, %c0_46] : memref<1x32x128xbf16, #tpu.memory_space<vmem>>, vector<1x32x128xbf16>
    %80 = vector.shape_cast %79 : vector<1x32x128xbf16> to vector<32x128xbf16>
    %cst_47 = arith.constant dense<0.000000e+00> : vector<16x128xf32>
    %81 = tpu.matmul %78, %80, %cst_47 {dimension_numbers = #tpu.dot_dimension_numbers<[1], [0], [0], [1], [0, 0, 1, 1], [], []>} : vector<16x32xbf16>, vector<32x128xbf16>, vector<16x128xf32> -> vector<16x128xf32>
    %c0_48 = arith.constant 0 : index
    %c0_49 = arith.constant 0 : index
    %c0_50 = arith.constant 0 : index
    %82 = vector.load %arg9[%c0_48, %c0_49, %c0_50] : memref<1x1x128xf32, #tpu.memory_space<vmem>>, vector<1x1x128xf32>
    %83 = vector.shape_cast %82 : vector<1x1x128xf32> to vector<1x128xf32>
    %84 = vector.broadcast %83 : vector<1x128xf32> to vector<16x128xf32>
    %85 = arith.addf %81, %84 : vector<16x128xf32>
    %cst_51 = arith.constant 0.000000e+00 : f32
    %86 = vector.broadcast %cst_51 : f32 to vector<16x128xf32>
    %87 = arith.maximumf %85, %86 : vector<16x128xf32>
    %88 = arith.truncf %87 : vector<16x128xf32> to vector<16x128xbf16>
    %c0_52 = arith.constant 0 : index
    %c0_53 = arith.constant 0 : index
    %c0_54 = arith.constant 0 : index
    %89 = vector.load %arg10[%c0_52, %c0_53, %c0_54] : memref<1x128x32xbf16, #tpu.memory_space<vmem>>, vector<1x128x32xbf16>
    %90 = vector.shape_cast %89 : vector<1x128x32xbf16> to vector<128x32xbf16>
    %cst_55 = arith.constant dense<0.000000e+00> : vector<16x32xf32>
    %91 = tpu.matmul %88, %90, %cst_55 {dimension_numbers = #tpu.dot_dimension_numbers<[1], [0], [0], [1], [0, 0, 1, 1], [], []>} : vector<16x128xbf16>, vector<128x32xbf16>, vector<16x32xf32> -> vector<16x32xf32>
    %c0_56 = arith.constant 0 : index
    %c0_57 = arith.constant 0 : index
    %c0_58 = arith.constant 0 : index
    %92 = vector.load %arg11[%c0_56, %c0_57, %c0_58] : memref<1x1x32xf32, #tpu.memory_space<vmem>>, vector<1x1x32xf32>
    %93 = vector.shape_cast %92 : vector<1x1x32xf32> to vector<1x32xf32>
    %94 = vector.broadcast %93 : vector<1x32xf32> to vector<16x32xf32>
    %95 = arith.addf %91, %94 : vector<16x32xf32>
    %c0_59 = arith.constant 0 : index
    %c0_60 = arith.constant 0 : index
    %96 = vector.load %arg15[%c0_59, %c0_60] : memref<16x32xf32, #tpu.memory_space<vmem>>, vector<16x32xf32>
    %97 = arith.addf %96, %95 : vector<16x32xf32>
    %c0_61 = arith.constant 0 : index
    %c0_62 = arith.constant 0 : index
    %98 = vector.load %arg15[%c0_61, %c0_62] : memref<16x32xf32, #tpu.memory_space<vmem>>, vector<16x32xf32>
    tpu.vector_store %arg15[%c0_61, %c0_62], %97 {strides = array<i32>} : memref<16x32xf32, #tpu.memory_space<vmem>>, vector<16x32xf32>,
    %c1_i32 = arith.constant 1 : i32
    %99 = arith.cmpi eq, %arg0, %c1_i32 : i32
    %100 = arith.extui %99 : i1 to i32
    %c0_i32_63 = arith.constant 0 : i32
    %101 = arith.cmpi ne, %100, %c0_i32_63 : i32
    scf.if %101 {
      %c0_64 = arith.constant 0 : index
      %c0_65 = arith.constant 0 : index
      %102 = vector.load %arg15[%c0_64, %c0_65] : memref<16x32xf32, #tpu.memory_space<vmem>>, vector<16x32xf32>
      %cst_66 = arith.constant dense<0.000000e+00> : vector<32xf32>
      %103 = vector.multi_reduction <add>, %102, %cst_66 [0] : vector<16x32xf32> to vector<32xf32>
      %104 = vector.shape_cast %103 : vector<32xf32> to vector<1x32xf32>
      %cst_67 = arith.constant 1.600000e+01 : f32
      %105 = vector.broadcast %cst_67 : f32 to vector<1x32xf32>
      %106 = arith.divf %104, %105 : vector<1x32xf32>
      %107 = arith.mulf %102, %102 : vector<16x32xf32>
      %cst_68 = arith.constant dense<0.000000e+00> : vector<32xf32>
      %108 = vector.multi_reduction <add>, %107, %cst_68 [0] : vector<16x32xf32> to vector<32xf32>
      %109 = vector.shape_cast %108 : vector<32xf32> to vector<1x32xf32>
      %cst_69 = arith.constant 1.600000e+01 : f32
      %110 = vector.broadcast %cst_69 : f32 to vector<1x32xf32>
      %111 = arith.divf %109, %110 : vector<1x32xf32>
      %112 = arith.mulf %106, %106 : vector<1x32xf32>
      %113 = arith.subf %111, %112 : vector<1x32xf32>
      %cst_70 = arith.constant 9.99999974E-6 : f32
      %114 = vector.broadcast %cst_70 : f32 to vector<1x32xf32>
      %115 = arith.addf %113, %114 : vector<1x32xf32>
      %116 = math.rsqrt %115 : vector<1x32xf32>
      %117 = vector.broadcast %106 : vector<1x32xf32> to vector<16x32xf32>
      %118 = arith.subf %102, %117 : vector<16x32xf32>
      %119 = vector.broadcast %116 : vector<1x32xf32> to vector<16x32xf32>
      %120 = arith.mulf %118, %119 : vector<16x32xf32>
      %c0_71 = arith.constant 0 : index
      %c0_72 = arith.constant 0 : index
      %121 = vector.load %arg12[%c0_71, %c0_72] : memref<1x32xf32, #tpu.memory_space<vmem>>, vector<1x32xf32>
      %122 = vector.broadcast %121 : vector<1x32xf32> to vector<16x32xf32>
      %123 = arith.mulf %120, %122 : vector<16x32xf32>
      %c0_73 = arith.constant 0 : index
      %c0_74 = arith.constant 0 : index
      %124 = vector.load %arg13[%c0_73, %c0_74] : memref<1x32xf32, #tpu.memory_space<vmem>>, vector<1x32xf32>
      %125 = vector.broadcast %124 : vector<1x32xf32> to vector<16x32xf32>
      %126 = arith.addf %123, %125 : vector<16x32xf32>
      %127 = vector.shape_cast %126 : vector<16x32xf32> to vector<2x8x32xf32>
      %c0_75 = arith.constant 0 : index
      %c0_76 = arith.constant 0 : index
      %c0_77 = arith.constant 0 : index
      %128 = vector.load %arg14[%c0_75, %c0_76, %c0_77] : memref<2x8x32xf32, #tpu.memory_space<vmem>>, vector<2x8x32xf32>
      tpu.vector_store %arg14[%c0_75, %c0_76, %c0_77], %127 {strides = array<i32>} : memref<2x8x32xf32, #tpu.memory_space<vmem>>, vector<2x8x32xf32>,
    } else {
    }
    return
  }
  func.func @transform_0(%arg0: i32) -> (i32, i32, i32) {
    %c0_i32 = arith.constant 0 : i32
    %c0_i32_0 = arith.constant 0 : i32
    %c0_i32_1 = arith.constant 0 : i32
    %c0_i32_2 = arith.constant 0 : i32
    return %c0_i32, %c0_i32_0, %c0_i32_1 : i32, i32, i32
  }
  func.func @transform_1(%arg0: i32) -> (i32, i32, i32) {
    %c0_i32 = arith.constant 0 : i32
    %c0_i32_0 = arith.constant 0 : i32
    %c0_i32_1 = arith.constant 0 : i32
    %c0_i32_2 = arith.constant 0 : i32
    return %c0_i32, %c0_i32_0, %c0_i32_1 : i32, i32, i32
  }
  func.func @transform_2(%arg0: i32) -> (i32, i32, i32) {
    %c0_i32 = arith.constant 0 : i32
    %c0_i32_0 = arith.constant 0 : i32
    %c0_i32_1 = arith.constant 0 : i32
    return %arg0, %c0_i32, %c0_i32_0 : i32, i32, i32
  }
  func.func @transform_3(%arg0: i32) -> (i32, i32, i32) {
    %c0_i32 = arith.constant 0 : i32
    %c0_i32_0 = arith.constant 0 : i32
    %c0_i32_1 = arith.constant 0 : i32
    return %arg0, %c0_i32, %c0_i32_0 : i32, i32, i32
  }
  func.func @transform_4(%arg0: i32) -> (i32, i32, i32) {
    %c0_i32 = arith.constant 0 : i32
    %c0_i32_0 = arith.constant 0 : i32
    %c0_i32_1 = arith.constant 0 : i32
    return %arg0, %c0_i32, %c0_i32_0 : i32, i32, i32
  }
  func.func @transform_5(%arg0: i32) -> (i32, i32, i32) {
    %c0_i32 = arith.constant 0 : i32
    %c0_i32_0 = arith.constant 0 : i32
    %c0_i32_1 = arith.constant 0 : i32
    return %arg0, %c0_i32, %c0_i32_0 : i32, i32, i32
  }
  func.func @transform_6(%arg0: i32) -> (i32, i32, i32) {
    %c0_i32 = arith.constant 0 : i32
    %c0_i32_0 = arith.constant 0 : i32
    %c0_i32_1 = arith.constant 0 : i32
    return %arg0, %c0_i32, %c0_i32_0 : i32, i32, i32
  }
  func.func @transform_7(%arg0: i32) -> (i32, i32, i32) {
    %c0_i32 = arith.constant 0 : i32
    %c0_i32_0 = arith.constant 0 : i32
    %c0_i32_1 = arith.constant 0 : i32
    return %arg0, %c0_i32, %c0_i32_0 : i32, i32, i32
  }
  func.func @transform_8(%arg0: i32) -> (i32, i32, i32) {
    %c0_i32 = arith.constant 0 : i32
    %c0_i32_0 = arith.constant 0 : i32
    %c0_i32_1 = arith.constant 0 : i32
    return %arg0, %c0_i32, %c0_i32_0 : i32, i32, i32
  }
  func.func @transform_9(%arg0: i32) -> (i32, i32, i32) {
    %c0_i32 = arith.constant 0 : i32
    %c0_i32_0 = arith.constant 0 : i32
    %c0_i32_1 = arith.constant 0 : i32
    return %arg0, %c0_i32, %c0_i32_0 : i32, i32, i32
  }
  func.func @transform_10(%arg0: i32) -> (i32, i32, i32) {
    %c0_i32 = arith.constant 0 : i32
    %c0_i32_0 = arith.constant 0 : i32
    %c0_i32_1 = arith.constant 0 : i32
    return %arg0, %c0_i32, %c0_i32_0 : i32, i32, i32
  }
  func.func @transform_11(%arg0: i32) -> (i32, i32) {
    %c0_i32 = arith.constant 0 : i32
    %c0_i32_0 = arith.constant 0 : i32
    %c0_i32_1 = arith.constant 0 : i32
    return %c0_i32, %c0_i32_0 : i32, i32
  }
  func.func @transform_12(%arg0: i32) -> (i32, i32) {
    %c0_i32 = arith.constant 0 : i32
    %c0_i32_0 = arith.constant 0 : i32
    %c0_i32_1 = arith.constant 0 : i32
    return %c0_i32, %c0_i32_0 : i32, i32
  }
  func.func @transform_13(%arg0: i32) -> (i32, i32, i32) {
    %c0_i32 = arith.constant 0 : i32
    %c0_i32_0 = arith.constant 0 : i32
    %c0_i32_1 = arith.constant 0 : i32
    %c0_i32_2 = arith.constant 0 : i32
    return %c0_i32, %c0_i32_0, %c0_i32_1 : i32, i32, i32
  }
}

</mosaic_0001>

<bundles_post_ra>
// kernel: tpu_custom_call.1
= control target key start
LH: loop header
LB: loop body
LE: loop exit
PB: predicated region body
PF: predicated region fallthrough
CT: control target
= control target key end

     0   :  { %s2823_s0 = inlined_call_operand.hbm [shape: bf16[2,8,32], index: 0, kind: input, shape index: {}]   ;;  %s2824_s1 = inlined_call_operand.hbm [shape: bf16[2,8,32], index: 1, kind: input, shape index: {}]   ;;  %s2825_s2 = inlined_call_operand.vmem [shape: bf16[2,32,96], index: 2, kind: input, shape index: {}]   ;;  %s2826_s3 = inlined_call_operand.vmem [shape: bf16[2,32,32], index: 3, kind: input, shape index: {}]   ;;  %s2827_s4 = inlined_call_operand.vmem [shape: bf16[2,32,32], index: 4, kind: input, shape index: {}]   ;;  %s2828_s5 = inlined_call_operand.vmem [shape: bf16[2,32,64], index: 5, kind: input, shape index: {}]   ;;  %s2829_s6 = inlined_call_operand.vmem [shape: bf16[2,32,32], index: 6, kind: input, shape index: {}]   ;;  %s2830_s7 = inlined_call_operand.hbm [shape: bf16[2,32,128], index: 7, kind: input, shape index: {}]   ;;  %s2831_s8 = inlined_call_operand.vmem [shape: f32[2,1,128], index: 8, kind: input, shape index: {}]   ;;  %s2832_s9 = inlined_call_operand.vmem [shape: bf16[2,128,32], index: 9, kind: input, shape index: {}]   ;;  %s2833_s10 = inlined_call_operand.vmem [shape: f32[2,1,32], index: 10, kind: input, shape index: {}]   ;;  %s2834_s11 = inlined_call_operand.vmem [shape: f32[1,32], index: 11, kind: input, shape index: {}]   ;;  %s2835_s12 = inlined_call_operand.vmem [shape: f32[1,32], index: 12, kind: input, shape index: {}]   ;;  %s2836_s13 = inlined_call_operand.hbm [shape: f32[2,8,32], index: 13, kind: output, shape index: {}]  }
   0x1   :  { %2844 = sst [smem:[#allocation16_spill]] %s2823_s0 }
   0x2   :  { %2845 = sst [smem:[#allocation17_spill]] %s2824_s1 }
   0x3   :  { %2846 = sst [smem:[#allocation18_spill]] %s2829_s6 }
   0x4   :  { %2847 = sst [smem:[#allocation19_spill]] %s2832_s9 }
   0x5   :  { %2848 = sst [smem:[#allocation20_spill]] %s2833_s10 }
   0x6   :  { %2849 = sst [smem:[#allocation21_spill]] %s2834_s11 }
   0x7   :  { %2850 = sst [smem:[#allocation22_spill]] %s2835_s12 }
   0x8   :  { %2851 = sst [smem:[#allocation23_spill]] %s2836_s13 }
   0x9   :  { %18 = vsyncpa [#allocation4], 0 }
   0xa   :  { %19 = vsyncpa [#allocation7], 0 }
   0xb   :  { %20 = vsyncpa [#allocation5], 0  ;;  %s2411_s25 = smov 0   ;;  %s2413_s26 = smov 0  }
   0xc   :  { %s2415_s27 = smov 0   ;;  %s2417_s28 = smov 0  }
   0xd LB: > { %s2430_s29 = sadd.s32 4294967295, %s2327_s28   ;;  %s2433_s30 = sadd.s32 1, %s2327_s28   ;;  %s2327_s28 = sphi %s2417_s28, %s2879_s28   ;;  %s2323_s27 = sphi %s2415_s27, %s2883_s27   ;;  %s2319_s26 = sphi %s2413_s26, %s2882_s26   ;;  %s2315_s25 = sphi %s2411_s25, %s2881_s25  }
   0xe   : > { %2852 = sst [smem:[#allocation14_spill]] %s2433_s30  ;;  %s202_s14 = ssub.s32 %s2327_s28, %s2433_s30 }
   0xf   : > { %s205_s15 = sadd.s32 1, %s2323_s27  ;;  %p203_p0 = scmp.eq.s32.totalorder %s202_s14, 0 }
  0x10   : > { %p212_p1 = scmp.ne.s32.totalorder %s2323_s27, %s2319_s26  ;;  %p213_p2 = scmp.eq.s32.totalorder %s2327_s28, 0 }
  0x11   : > { %p218_p3 = scmp.ne.s32.totalorder %s2319_s26, %s2315_s25  ;;  %p2839_p5 = scmp.eq.s32.totalorder %s2430_s29, 0 }
  0x12   : > { %s2443_s16 = scalar_select %p203_p0, %s2323_s27, %s205_s15  }
  0x13   : > { %p2445_p4 = por %p213_p2, %p212_p1  ;;  %p1817_p6 = scmp.ge.s32.totalorder %s2327_s28, 1 }
  0x14   : > { %2853 = sst [smem:[#allocation15_spill]] %s2443_s16  ;;  %p370_p7 = scmp.lt.s32.totalorder %s2327_s28, 3 }
  0x15   : > { %p2454_p8 = por %p2839_p5, %p218_p3  ;;  %s2329_s20 = smov [#allocation3]  }
  0x16   : > { %p2459_p10 = pnand %p1817_p6, %p370_p7  ;;  %s382_s21 = sshll.u32 %s2329_s20, 4  ;;  %s383_s21 = int_to_ptr.vmem [resolvable:$true] %s382_s21 }
  0x17   : > { %s2855_s18 = scalar_select %p2454_p8, 1, 0 }
  0x18   : > { %s2856_s19 = scalar_select %p2459_p10, 1, 0 }
  0x19   : > { %p2069_p11 = pneg %p2459_p10  ;;  %p2082_p13 = scmp.lt.s32.totalorder %s2327_s28, 2 }
  0x1a   : > { %s2859_s0 = sld [smem:[#allocation16_spill]] }
  0x1b   : > { %p2467_p12 = pnand %p2069_p11, %p2839_p5  ;;  %p2474_p0 = pnand %p2082_p13, %p2445_p4 }
  0x1d   : > { %s2858_s23 = scalar_select %p2474_p0, 1, 0 }
  0x1e   : > { %p2171_p2 = pneg %p2467_p12 }
  0x20   : > { %s2169_s14 = scalar_lea.hbm %s2859_s0, 128 }
  0x21   : > { %p2170_p1 = scmp.ne.s32.totalorder %s2859_s0, %s2169_s14  ;;  %p2176_p4 = scmp.lt.u32.totalorder %s2169_s14, %s2859_s0 }
  0x23   : > { %p2172_p3 = pnand %p2171_p2, %p2170_p1 }
  0x25   : > { %p2173_p6 = pneg %p2172_p3 }
  0x27   : > { %p2178_p7 = pnand %p2176_p4, %p2173_p6 }
  0x29   : > { %2181 = shalt.err (!%p2178_p7)
}
  0x2a   : > { %s2182_s30 = scalar_lea.vmem %s383_s21, 128  ;;  %p2190_p5 = scmp.lt.s32.totalorder %s383_s21, %s383_s21 }
  0x2b   : > { %p2183_p11 = scmp.ne.s32.totalorder %s383_s21, %s2182_s30  ;;  %p2191_p8 = scmp.lt.s32.totalorder %s2182_s30, %s2182_s30 }
  0x2d   : > { %p2185_p13 = pnand %p2183_p11, %p2171_p2  ;;  %p2192_p10 = por %p2191_p8, %p2190_p5 }
  0x2f   : > { %p2186_p9 = pneg %p2185_p13 }
  0x31   : > { %p2193_p0 = pnand %p2192_p10, %p2186_p9 }
  0x33   : > { %2196 = shalt.err (!%p2193_p0)
}
  0x34   : > { %s2330_s24 = smov 64   ;;  %s2331_s16 = smov 4  }
  0x35   : > { %2072 = dma.hbm_to_vmem [thread:$0]  (!%p2467_p12), %s2859_s0, 128, %s383_s21, [#allocation4], %s2330_s24, %s2330_s24, %s2331_s16  }
  0x36   : > { %s2332_s15 = smov [#allocation6]   ;;  %s455_s30 = sand.u32 1, %s2327_s28  }
  0x37   : > { %s395_s20 = sshll.u32 %s2332_s15, 4  ;;  %s2860_s1 = sld [smem:[#allocation17_spill]]  ;;  %s396_s20 = int_to_ptr.vmem [resolvable:$true] %s395_s20 }
  0x3d   : > { %s2197_s12 = scalar_lea.hbm %s2860_s1, 128 }
  0x3e   : > { %p2198_p5 = scmp.ne.s32.totalorder %s2860_s1, %s2197_s12  ;;  %p2204_p10 = scmp.lt.u32.totalorder %s2197_s12, %s2860_s1 }
  0x40   : > { %p2200_p8 = pnand %p2198_p5, %p2171_p2 }
  0x42   : > { %p2201_p9 = pneg %p2200_p8 }
  0x44   : > { %p2206_p0 = pnand %p2204_p10, %p2201_p9 }
  0x46   : > { %2209 = shalt.err (!%p2206_p0)
}
  0x47   : > { %s2210_s21 = scalar_lea.vmem %s396_s20, 128  ;;  %p2218_p4 = scmp.lt.s32.totalorder %s396_s20, %s396_s20 }
  0x48   : > { %p2211_p1 = scmp.ne.s32.totalorder %s396_s20, %s2210_s21  ;;  %p2219_p7 = scmp.lt.s32.totalorder %s2210_s21, %s2210_s21 }
  0x4a   : > { %p2213_p3 = pnand %p2211_p1, %p2171_p2  ;;  %p2220_p11 = por %p2219_p7, %p2218_p4 }
  0x4c   : > { %p2214_p6 = pneg %p2213_p3 }
  0x4e   : > { %p2221_p13 = pnand %p2220_p11, %p2214_p6 }
  0x50   : > { %2224 = shalt.err (!%p2221_p13)
}
  0x51   : > { %2075 = dma.hbm_to_vmem [thread:$0]  (!%p2467_p12), %s2860_s1, 128, %s396_s20, [#allocation7], %s2330_s24, %s2330_s24, %s2331_s16  }
  0x52   : > { %s457_s10 = sand.u32 1, %s2323_s27   ;;  %s1885_s11 = sshll.u32 %s2327_s28, 8 }
  0x53   : > { %s1821_s12 = sshll.u32 %s457_s10, 4  ;;  %s2532_s14 = scalar_lea.hbm %s2830_s7, %s1885_s11 }
  0x54   : > { %s459_s22 = scalar_lea.vmem [#allocation8], %s1821_s12  ;;  %s2536_s17 = scalar_lea.sflag [#allocation4], %s455_s30 }
  0x55   : > { %s466_s15 = sshll.u32 %s459_s22, 4  ;;  %s2225_s21 = scalar_lea.hbm %s2532_s14, 256  ;;  %s2534_s15 = int_to_ptr.vmem [resolvable:$true] %s466_s15 }
  0x56   : > { %p2226_p12 = scmp.ne.s32.totalorder %s2532_s14, %s2225_s21  ;;  %p2861_p2 = scmp.ne.s32.totalorder %s2858_s23, 0 }
  0x57   : > { %s2230_s6 = scalar_lea.hbm %s2830_s7, 512  ;;  %p2231_p10 = scmp.lt.u32.totalorder %s2532_s14, %s2830_s7 }
  0x58   : > { %p2227_p5 = pneg %p2861_p2  ;;  %p2232_p0 = scmp.lt.u32.totalorder %s2230_s6, %s2225_s21 }
  0x59   : > { %p2234_p3 = scmp.lt.u32.totalorder %s2225_s21, %s2532_s14 }
  0x5a   : > { %p2228_p8 = pnand %p2227_p5, %p2226_p12  ;;  %p2233_p1 = por %p2232_p0, %p2231_p10 }
  0x5c   : > { %p2229_p9 = pneg %p2228_p8  ;;  %p2235_p6 = por %p2234_p3, %p2233_p1 }
  0x5e   : > { %p2236_p4 = pnand %p2235_p6, %p2229_p9 }
  0x60   : > { %2239 = shalt.err (!%p2236_p4)
}
  0x61   : > { %s2240_s30 = scalar_lea.vmem %s2534_s15, 256  ;;  %s2333_s11 = smov [#allocation8]  }
  0x62   : > { %p2241_p7 = scmp.ne.s32.totalorder %s2534_s15, %s2240_s30  ;;  %s2245_s12 = sshll.u32 %s2333_s11, 4  ;;  %s2246_s12 = int_to_ptr.vmem [resolvable:$false] %s2245_s12 }
  0x63   : > { %s2247_s13 = scalar_lea.vmem %s2246_s12, 512  ;;  %p2248_p12 = scmp.lt.s32.totalorder %s2534_s15, %s2246_s12 }
  0x64   : > { %p2243_p11 = pnand %p2241_p7, %p2227_p5  ;;  %p2249_p8 = scmp.lt.s32.totalorder %s2247_s13, %s2240_s30 }
  0x66   : > { %p2244_p13 = pneg %p2243_p11  ;;  %p2250_p10 = por %p2249_p8, %p2248_p12 }
  0x68   : > { %p2251_p0 = pnand %p2250_p10, %p2244_p13 }
  0x6a   : > { %2254 = shalt.err (!%p2251_p0)
}
  0x6b   : > { %2079 = dma.hbm_to_vmem [thread:$0]  (!%p2861_p2), %s2532_s14, 256, %s2534_s15, %s2536_s17, %s2330_s24, %s2330_s24, %s2331_s16  }
  0x6c   : > { %p2862_p5 = scmp.ne.s32.totalorder %s2856_s19, 0 }
  0x6d   : > { %p2863_p9 = scmp.eq.s32.totalorder (!%p2862_p5), %s2430_s29, 0 }
  0x6e   : > { %498 = sbr.rel (%p2862_p5) target bundleno = 3169 (0xc61), region = 72 }
  0x75   : > { %2298 = dma.done.wait (%p2863_p9), [#allocation4], 128   ;;  %p2864_p1 = pmov %p2863_p9 }
  0x77   : > { %2300 = vsyncadd (%p2864_p1), [#allocation4], 4294967168  ;;  %p2865_p3 = pmov %p2864_p1 }
  0x78   : > { %p2866_p6 = pmov %p2864_p1 }
  0x79   : > { %2302 = dma.done.wait (%p2865_p3), [#allocation7], 128  }
  0x7a   : > { %2304 = vsyncadd (%p2866_p6), [#allocation7], 4294967168  ;;  %s508_s23 = sand.u32 1, %s2430_s29   ;;  %s510_s24 = sand.u32 1, %s2319_s26  }
  0x7b   : > { %s2579_s16 = sshll.u32 %s510_s24, 4  ;;  %s509_s19 = scalar_lea.sflag [#allocation4], %s508_s23 }
  0x7c   : > { %p2867_p2 = scmp.ne.s32.totalorder %s2855_s18, 0 }
  0x7e   : > { %2306 = dma.done.wait (%p2867_p2), %s509_s19, 256  }
  0x7f   : > { %2308 = vsyncadd (%p2867_p2), %s509_s19, 4294967040  ;;  %p586_p4 = scmp.lt.s32.totalorder %s2430_s29, 1  ;;  %s2868_s17 = sld [smem:[#allocation18_spill]] }
  0x80   : > { %s2869_s9 = sld [smem:[#allocation19_spill]]  ;;  %s2870_s11 = sld [smem:[#allocation20_spill]] }
  0x81   : > { %s2588_s14 = scalar_select %p586_p4, %s2430_s29, 1 }
  0x82   : > { %p2871_p7 = scmp.ne.s32.totalorder %s2430_s29, 0 }
  0x83   : > { %s1886_s22 = sshll.u32 %s2588_s14, 4  ;;  %s1891_s20 = sshll.u32 %s2588_s14, 6  ;;  %v1893_v0 = vld [vmem:[#allocation3] sm:$0xff] (!%p2871_p7)   ;;  %vm631_vm0 = vcmask (!%p2871_p7), 261120  }
  0x84   : > { %s590_s6 = scalar_lea.vmem %s2825_s2, %s1886_s22  ;;  %s2601_s10 = scalar_lea.vmem %s2826_s3, %s1886_s22  ;;  %v1894_v1 = vunpack.c.l.bf16 (!%p2871_p7), %v1893_v0  ;;  %v1895_v2 = vunpack.c.h.bf16 (!%p2871_p7), %v1893_v0 }
  0x85   : > { %s2606_s12 = scalar_lea.vmem %s2827_s4, %s1886_s22  ;;  %s2611_s24 = scalar_lea.vmem %s2828_s5, %s1886_s22 }
  0x86   : > { %s2616_s28 = scalar_lea.vmem %s2868_s17, %s1886_s22  ;;  %s2622_s25 = scalar_lea.vmem %s2869_s9, %s1891_s20  ;;  %632 = vst.msk [vmem:[#allocation2] sm:$0xff] (!%p2871_p7), %vm631_vm0, %v1894_v1  ;;  %633 = vst.msk [vmem:[#allocation2 + $0x8] sm:$0xff] (!%p2871_p7), %vm631_vm0, %v1895_v2 }
  0x87   : > { %s621_s1 = scalar_lea.vmem %s2870_s11, %s2588_s14  ;;  %626 = sbr.rel (%p2871_p7) target bundleno = 142 (0x8e), region = 88 }
  0x8e PF: > { %v2130_v3 = vld [vmem:[%s590_s6] sm:$0xff]   ;;  %v2334_v4 = vmov 0.0   ;;  %v2131_v5 = vld [vmem:[%s590_s6 + $0x8] sm:$0xff]   ;;  %vm2335_vm1 = vmmov 0   ;;  %vm653_vm2 = vcmask 261120   ;;  %s2336_s0 = smov 96  }
  0x8f   : > { %1939 = vmatprep.subr.bf16.mxu1 %v2334_v4  ;;  %1965 = vmatprep.subr.bf16.mxu0 %v2334_v4  ;;  %v2634_v6 = vld [vmem:[#allocation2] sm:$0xff]  ;;  %v2636_v7 = vld [vmem:[#allocation2 + $0x8] sm:$0xff]  ;;  %vm798_vm3 = vcmask 64512   ;;  %s2337_s22 = smov 64   ;;  %vm828_vm4 = vcmask 1043456   ;;  %v2136_v0 = vld [vmem:[#allocation6] sm:$0xff]  }
  0x90   : > { %1940 = vmatpush3.bf16.msra.mxu1 %v2130_v3  ;;  %1943 = vmatprep.mubr.msk.bf16.mxu1 %vm2335_vm1, %v2334_v4  ;;  %v636_v8 = vpack.c.bf16 %v2636_v7, %v2634_v6  ;;  %v2132_v51 = vld [vmem:[%s2601_s10] sm:$0xff]   ;;  %v2133_v52 = vld [vmem:[%s2601_s10 + $0x8] sm:$0xff]   ;;  %s2872_s21 = scalar_lea.vmem [#allocation8], %s2579_s16  ;;  %p1878_p11 = scmp.ne.s32.totalorder %s2430_s29, 1 }
  0x91   : > { %1941 = vmatprep.subr.bf16.mxu1 %v2334_v4  ;;  %1967 = vmatprep.mubr.msk.bf16.mxu0 %vm2335_vm1, %v2334_v4  ;;  %v2134_v58 = vld [vmem:[%s2611_s24] sm:$0xff]   ;;  %v2135_v63 = vld [vmem:[%s2611_s24 + $0x8] sm:$0xff]   ;;  %s2873_s6 = smov %s2872_s21  ;;  %s2877_s17 = sld [smem:[#allocation22_spill]] (!%p1878_p11) }
  0x92   : > { %v2137_v1 = vld [vmem:[%s2606_s12] sm:$0xff]   ;;  %v2138_v2 = vld [vmem:[%s2606_s12 + $0x8] sm:$0xff]   ;;  %s2874_s12 = scalar_lea.vmem %s2831_s8, %s2588_s14  ;;  %s2876_s14 = sld [smem:[#allocation21_spill]] (!%p1878_p11) }
  0x94   : > { %1942 = vmatpush3.bf16.msra.mxu1 %v2131_v5 }
  0x95   : > { %1947 = vmatprep.subr.bf16.mxu1 %v2334_v4 }
  0x97   : > { %1944 = vmatmul.mubr.msk.bf16.vlgmr.msra.gmra.mrb[0].mxu1 %vm653_vm2, %v636_v8 }
  0x98   : > { %1949 = vmatprep.mubr.msk.bf16.mxu1 %vm2335_vm1, %v2334_v4 }
 0x16a   : > { %v691_v9 = vpop.f32.mrb[0].mxu1 }
 0x16b   : > { %v698_v10 = vpack.c.bf16 %v691_v9, %v691_v9  ;;  %v1945_v11 = vpop.f32.mrb[1].mxu1 }
 0x16c   : > { %v694_v12 = vpop.f32.mrb[2].mxu1 }
 0x16d   : > { %701 = vrot.lane.b32.xlu0 %v698_v10, %s2336_s0  ;;  %v1946_v13 = vpop.f32.mrb[3].mxu1  ;;  %v699_v14 = vpack.c.bf16 %v694_v12, %v694_v12 }
 0x171   : > { %750 = vrot.lane.b32.xlu0 %v699_v14, %s2336_s0 }
 0x1df   : > { %v702_v15 = vpop.permute.xlu0 %701 }
 0x1e0   : > { %v707_v16 = vsel %vm653_vm2, %v702_v15, 0 }
 0x1e1   : > { %1948 = vmatpush3.bf16.xpose.msra.mxu1 %v707_v16 }
 0x1e2   : > { %1953 = vmatprep.subr.bf16.mxu1 %v2334_v4 }
 0x1e3   : > { %v751_v17 = vpop.permute.xlu0 %750 }
 0x1e4   : > { %v756_v18 = vsel %vm653_vm2, %v751_v17, 0 }
 0x1e8   : > { %1950 = vmatmul.mubr.msk.bf16.vlgmr.msra.gmra.mrb[4].mxu1 %vm653_vm2, %v698_v10 }
 0x1e9   : > { %1954 = vmatpush3.bf16.xpose.msra.mxu1 %v756_v18  ;;  %1955 = vmatprep.mubr.msk.bf16.mxu1 %vm2335_vm1, %v2334_v4 }
 0x1ea   : > { %1959 = vmatprep.subr.bf16.mxu1 %v2334_v4 }
 0x1f0   : > { %1956 = vmatmul.mubr.msk.bf16.vlgmr.msra.gmra.mrb[8].mxu1 %vm653_vm2, %v699_v14 }
 0x1f1   : > { %1961 = vmatprep.mubr.msk.bf16.mxu1 %vm2335_vm1, %v2334_v4 }
 0x2bb   : > { %v743_v19 = vpop.f32.mrb[4].mxu1 }
 0x2bc   : > { %v1951_v20 = vpop.f32.mrb[5].mxu1  ;;  %v799_v21 = vsel %vm798_vm3, %v743_v19, -inf }
 0x2bd   : > { %800 = vmax.xlane.f32.xlu1 %v799_v21  ;;  %v746_v22 = vpop.f32.mrb[6].mxu1 }
 0x2be   : > { %v1952_v23 = vpop.f32.mrb[7].mxu1 }
 0x2c3   : > { %v792_v24 = vpop.f32.mrb[8].mxu1 }
 0x2c4   : > { %v1957_v25 = vpop.f32.mrb[9].mxu1  ;;  %v802_v26 = vsel %vm798_vm3, %v792_v24, -inf }
 0x2c5   : > { %803 = vmax.xlane.f32.xlu1 %v802_v26  ;;  %v795_v27 = vpop.f32.mrb[10].mxu1 }
 0x2c6   : > { %v1958_v28 = vpop.f32.mrb[11].mxu1 }
 0x2d6   : > { %823 = vrot.lane.b32.xlu1 %v698_v10, %s2337_s22 }
 0x34a   : > { %v801_v29 = vpop.xlane.xlu1 %800 }
 0x34b   : > { %v805_v30 = vsub.f32 %v743_v19, %v801_v29 }
 0x34d   : > { %v807_v31 = vmul.f32 1.442695, %v805_v30 }
 0x34f   : > { %2151 = vpow2.f32 %v807_v31 }
 0x352   : > { %v804_v32 = vpop.xlane.xlu1 %803 }
 0x353   : > { %v806_v33 = vsub.f32 %v792_v24, %v804_v32 }
 0x355   : > { %v809_v34 = vmul.f32 1.442695, %v806_v33 }
 0x356   : > { %v824_v35 = vpop.permute.xlu1 %823 }
 0x357   : > { %2153 = vpow2.f32 %v809_v34  ;;  %v830_v36 = vsel %vm828_vm4, %v824_v35, 0 }
 0x358   : > { %1960 = vmatpush3.bf16.msra.mxu1 %v830_v36 }
 0x359   : > { %v2152_v37 = vpop.eup %2151  ;;  %1971 = vmatprep.subr.bf16.mxu1 %v2334_v4 }
 0x35a   : > { %v811_v38 = vsel %vm798_vm3, %v2152_v37, 0.0 }
 0x35b   : > { %812 = vadd.xlane.f32.xlu0 %v811_v38 }
 0x361   : > { %v2154_v39 = vpop.eup %2153 }
 0x362   : > { %v814_v40 = vsel %vm798_vm3, %v2154_v39, 0.0 }
 0x363   : > { %815 = vadd.xlane.f32.xlu1 %v814_v40 }
 0x374   : > { %872 = vrot.lane.b32.xlu1 %v699_v14, %s2337_s22 }
 0x3e8   : > { %v813_v41 = vpop.xlane.xlu0 %812 }
 0x3e9   : > { %2155 = vrcp.f32 %v813_v41 }
 0x3f0   : > { %v816_v42 = vpop.xlane.xlu1 %815 }
 0x3f1   : > { %2157 = vrcp.f32 %v816_v42 }
 0x3f3   : > { %v2156_v43 = vpop.eup %2155 }
 0x3f4   : > { %v819_v44 = vmul.f32 %v2156_v43, %v2152_v37  ;;  %v873_v45 = vpop.permute.xlu1 %872 }
 0x3f5   : > { %v878_v46 = vsel %vm828_vm4, %v873_v45, 0 }
 0x3f6   : > { %1966 = vmatpush3.bf16.msra.mxu0 %v878_v46  ;;  %v821_v47 = vpack.c.bf16 %v819_v44, %v819_v44 }
 0x3f7   : > { %1979 = vmatprep.subr.bf16.mxu0 %v2334_v4 }
 0x3f8   : > { %1962 = vmatmul.mubr.msk.bf16.vlgmr.msra.gmra.mrb[12].mxu1 %vm798_vm3, %v821_v47 }
 0x3f9   : > { %1975 = vmatprep.mubr.msk.bf16.mxu1 %vm2335_vm1, %v2334_v4  ;;  %1972 = vmatpush3.bf16.msra.mxu1 %v2132_v51 }
 0x3fa   : > { %1973 = vmatprep.subr.bf16.mxu1 %v2334_v4 }
 0x3fb   : > { %v2158_v48 = vpop.eup %2157 }
 0x3fc   : > { %v820_v49 = vmul.f32 %v2158_v48, %v2154_v39 }
 0x3fd   : > { %1974 = vmatpush3.bf16.msra.mxu1 %v2133_v52 }
 0x3fe   : > { %v822_v50 = vpack.c.bf16 %v820_v49, %v820_v49  ;;  %1987 = vmatprep.subr.bf16.mxu1 %v2334_v4 }
 0x400   : > { %1968 = vmatmul.mubr.msk.bf16.vlgmr.msra.gmra.mrb[0].mxu0 %vm798_vm3, %v822_v50 }
 0x401   : > { %1983 = vmatprep.mubr.msk.bf16.mxu0 %vm2335_vm1, %v2334_v4  ;;  %1980 = vmatpush3.bf16.msra.mxu0 %v2137_v1 }
 0x402   : > { %1981 = vmatprep.subr.bf16.mxu0 %v2334_v4 }
 0x405   : > { %1982 = vmatpush3.bf16.msra.mxu0 %v2138_v2 }
 0x406   : > { %1995 = vmatprep.subr.bf16.mxu0 %v2334_v4 }
 0x4cb   : > { %v866_v53 = vpop.f32.mrb[12].mxu1 }
 0x4cc   : > { %v1963_v54 = vpop.f32.mrb[13].mxu1 }
 0x4cd   : > { %v869_v55 = vpop.f32.mrb[14].mxu1 }
 0x4ce   : > { %v1964_v56 = vpop.f32.mrb[15].mxu1 }
 0x4d3   : > { %v914_v57 = vpop.f32.mrb[0].mxu0 }
 0x4d4   : > { %v922_v59 = vpack.c.bf16 %v914_v57, %v866_v53  ;;  %v1969_v60 = vpop.f32.mrb[1].mxu0 }
 0x4d5   : > { %v917_v61 = vpop.f32.mrb[2].mxu0  ;;  %v2140_v60 = vld [vmem:[%s2616_s28 + $0x8] sm:$0xff]  }
 0x4d6   : > { %v1970_v62 = vpop.f32.mrb[3].mxu0  ;;  %1976 = vmatmul.mubr.msk.bf16.vlgmr.msra.gmra.mrb[16].mxu1 %vm653_vm2, %v922_v59  ;;  %v2139_v59 = vld [vmem:[%s2616_s28] sm:$0xff]  }
 0x4d7   : > { %1988 = vmatpush3.bf16.msra.mxu1 %v2134_v58  ;;  %1991 = vmatprep.mubr.msk.bf16.mxu1 %vm2335_vm1, %v2334_v4 }
 0x4d8   : > { %1989 = vmatprep.subr.bf16.mxu1 %v2334_v4 }
 0x4db   : > { %1990 = vmatpush3.bf16.msra.mxu1 %v2135_v63 }
 0x4dc   : > { %2001 = vmatprep.subr.bf16.mxu1 %v2334_v4 }
 0x4de   : > { %1992 = vmatmul.mubr.msk.bf16.vlgmr.msra.gmra.mrb[20].mxu1 %vm653_vm2, %v2136_v0 }
 0x4df   : > { %2003 = vmatprep.mubr.msk.bf16.mxu1 %vm2335_vm1, %v2334_v4 }
 0x5a9   : > { %v976_v3 = vpop.f32.mrb[16].mxu1 }
 0x5aa   : > { %v983_v5 = vadd.f32 %v976_v3, %v2634_v6  ;;  %v1977_v8 = vpop.f32.mrb[17].mxu1 }
 0x5ab   : > { %v979_v9 = vpop.f32.mrb[18].mxu1 }
 0x5ac   : > { %985 = vst.msk [vmem:[#allocation2] sm:$0xff] %vm653_vm2, %v983_v5  ;;  %v984_v10 = vadd.f32 %v979_v9, %v2636_v7  ;;  %v1978_v11 = vpop.f32.mrb[19].mxu1  ;;  %v2141_v9 = vld [vmem:[%s2872_s21] sm:$0xff]  }
 0x5ad   : > { %v2143_v11 = vld [vmem:[%s2622_s25] sm:$0xff]  }
 0x5ae   : > { %986 = vst.msk [vmem:[#allocation2 + $0x8] sm:$0xff] %vm653_vm2, %v984_v10  ;;  %v2142_v10 = vld [vmem:[%s2873_s6 + $0x8] sm:$0xff]  }
 0x5b1   : > { %v1112_v6 = vpop.f32.mrb[20].mxu1 }
 0x5b2   : > { %v1119_v15 = vpack.c.bf16 %v1112_v6, %v1112_v6  ;;  %v1993_v16 = vpop.f32.mrb[21].mxu1  ;;  %v2145_v6 = vld [vmem:[%s2622_s25 + $0x10] sm:$0xff]  }
 0x5b3   : > { %v2695_v12 = vld [vmem:[#allocation2] sm:$0xff]  ;;  %v1115_v17 = vpop.f32.mrb[22].mxu1 }
 0x5b4   : > { %v1125_v7 = vsel %vm653_vm2, %v1119_v15, 0  ;;  %v1120_v18 = vpack.c.bf16 %v1115_v17, %v1115_v17  ;;  %v1994_v19 = vpop.f32.mrb[23].mxu1  ;;  %v2147_v16 = vld [vmem:[%s2622_s25 + $0x20] sm:$0xff]   ;;  %v2148_v17 = vld [vmem:[%s2622_s25 + $0x28] sm:$0xff]  }
 0x5b5   : > { %v2697_v13 = vld [vmem:[#allocation2 + $0x8] sm:$0xff] }
 0x5b6   : > { %v989_v14 = vpack.c.bf16 %v2697_v13, %v2695_v12  ;;  %v1171_v20 = vsel %vm653_vm2, %v1120_v18, 0 }
 0x5b7   : > { %2002 = vmatpush3.bf16.xpose.msra.mxu1 %v1171_v20 }
 0x5b8   : > { %1984 = vmatmul.mubr.msk.bf16.vlgmr.msra.gmra.mrb[4].mxu0 %vm653_vm2, %v989_v14  ;;  %2013 = vmatprep.subr.bf16.mxu1 %v2334_v4  ;;  %v2144_v14 = vld [vmem:[%s2622_s25 + $0x8] sm:$0xff]  }
 0x5b9   : > { %1997 = vmatprep.mubr.msk.bf16.mxu0 %vm2335_vm1, %v2334_v4  ;;  %1996 = vmatpush3.bf16.xpose.msra.mxu0 %v1125_v7 }
 0x5ba   : > { %2007 = vmatprep.subr.bf16.mxu0 %v2334_v4 }
 0x68b   : > { %v1045_v21 = vpop.f32.mrb[4].mxu0 }
 0x68c   : > { %v1052_v22 = vpack.c.bf16 %v1045_v21, %v1045_v21  ;;  %v1985_v23 = vpop.f32.mrb[5].mxu0 }
 0x68d   : > { %v1048_v24 = vpop.f32.mrb[6].mxu0 }
 0x68e   : > { %v1053_v25 = vpack.c.bf16 %v1048_v24, %v1048_v24  ;;  %v1986_v26 = vpop.f32.mrb[7].mxu0  ;;  %1998 = vmatmul.mubr.msk.bf16.vlgmr.msra.gmra.mrb[8].mxu0 %vm653_vm2, %v1052_v22 }
 0x68f   : > { %2009 = vmatprep.mubr.msk.bf16.mxu0 %vm2335_vm1, %v2334_v4  ;;  %v2149_v26 = vld [vmem:[%s2622_s25 + $0x30] sm:$0xff]  }
 0x690   : > { %2004 = vmatmul.mubr.msk.bf16.vlgmr.msra.gmra.mrb[24].mxu1 %vm653_vm2, %v1053_v25 }
 0x691   : > { %2015 = vmatprep.mubr.msk.bf16.mxu1 %vm2335_vm1, %v2334_v4 }
 0x761   : > { %v1161_v27 = vpop.f32.mrb[8].mxu0 }
 0x762   : > { %v1999_v28 = vpop.f32.mrb[9].mxu0  ;;  %v1213_v29 = vsel %vm798_vm3, %v1161_v27, -inf }
 0x763   : > { %1214 = vmax.xlane.f32.xlu1 %v1213_v29  ;;  %v1164_v30 = vpop.f32.mrb[10].mxu0  ;;  %v1207_v31 = vpop.f32.mrb[24].mxu1 }
 0x764   : > { %v2000_v32 = vpop.f32.mrb[11].mxu0  ;;  %v2005_v33 = vpop.f32.mrb[25].mxu1  ;;  %v1216_v34 = vsel %vm798_vm3, %v1207_v31, -inf }
 0x765   : > { %1217 = vmax.xlane.f32.xlu0 %v1216_v34  ;;  %v1210_v35 = vpop.f32.mrb[26].mxu1 }
 0x766   : > { %v2006_v36 = vpop.f32.mrb[27].mxu1 }
 0x774   : > { %1287 = vrot.lane.b32.xlu1 %v1120_v18, %s2336_s0 }
 0x7f0   : > { %v1215_v37 = vpop.xlane.xlu1 %1214 }
 0x7f1   : > { %v1219_v38 = vsub.f32 %v1161_v27, %v1215_v37 }
 0x7f2   : > { %v1218_v39 = vpop.xlane.xlu0 %1217 }
 0x7f3   : > { %v1221_v40 = vmul.f32 1.442695, %v1219_v38  ;;  %v1220_v41 = vsub.f32 %v1207_v31, %v1218_v39 }
 0x7f4   : > { %v1288_v42 = vpop.permute.xlu1 %1287 }
 0x7f5   : > { %2159 = vpow2.f32 %v1221_v40  ;;  %v1223_v43 = vmul.f32 1.442695, %v1220_v41  ;;  %v1293_v44 = vsel %vm828_vm4, %v1288_v42, 0 }
 0x7f6   : > { %2014 = vmatpush3.bf16.msra.mxu1 %v1293_v44 }
 0x7f7   : > { %2161 = vpow2.f32 %v1223_v43  ;;  %2027 = vmatprep.subr.bf16.mxu1 %v2334_v4 }
 0x7ff   : > { %v2160_v45 = vpop.eup %2159 }
 0x800   : > { %v1225_v46 = vsel %vm798_vm3, %v2160_v45, 0.0 }
 0x801   : > { %v2162_v47 = vpop.eup %2161  ;;  %1226 = vadd.xlane.f32.xlu0 %v1225_v46 }
 0x802   : > { %v1228_v48 = vsel %vm798_vm3, %v2162_v47, 0.0 }
 0x805   : > { %1229 = vadd.xlane.f32.xlu0 %v1228_v48 }
 0x81b   : > { %1238 = vrot.lane.b32.xlu0 %v1119_v15, %s2336_s0  ;;  %v2146_v15 = vld [vmem:[%s2622_s25 + $0x18] sm:$0xff]  }
 0x88e   : > { %v1227_v49 = vpop.xlane.xlu0 %1226 }
 0x88f   : > { %2163 = vrcp.f32 %v1227_v49 }
 0x892   : > { %v1230_v50 = vpop.xlane.xlu0 %1229 }
 0x893   : > { %2165 = vrcp.f32 %v1230_v50 }
 0x896   : > { %v1239_v51 = vpop.permute.xlu0 %1238 }
 0x897   : > { %v1244_v52 = vsel %vm828_vm4, %v1239_v51, 0 }
 0x898   : > { %2008 = vmatpush3.bf16.msra.mxu0 %v1244_v52 }
 0x899   : > { %v2164_v53 = vpop.eup %2163  ;;  %2019 = vmatprep.subr.bf16.mxu0 %v2334_v4 }
 0x89a   : > { %v1233_v54 = vmul.f32 %v2164_v53, %v2160_v45 }
 0x89c   : > { %v1235_v55 = vpack.c.bf16 %v1233_v54, %v1233_v54 }
 0x89d   : > { %v2166_v56 = vpop.eup %2165 }
 0x89e   : > { %v1234_v57 = vmul.f32 %v2166_v56, %v2162_v47  ;;  %2010 = vmatmul.mubr.msk.bf16.vlgmr.msra.gmra.mrb[12].mxu0 %vm798_vm3, %v1235_v55 }
 0x89f   : > { %2023 = vmatprep.mubr.msk.bf16.mxu0 %vm2335_vm1, %v2334_v4  ;;  %2020 = vmatpush3.bf16.msra.mxu0 %v2139_v59 }
 0x8a0   : > { %v1236_v58 = vpack.c.bf16 %v1234_v57, %v1234_v57  ;;  %2021 = vmatprep.subr.bf16.mxu0 %v2334_v4 }
 0x8a2   : > { %2016 = vmatmul.mubr.msk.bf16.vlgmr.msra.gmra.mrb[28].mxu1 %vm798_vm3, %v1236_v58 }
 0x8a3   : > { %2031 = vmatprep.mubr.msk.bf16.mxu1 %vm2335_vm1, %v2334_v4  ;;  %2022 = vmatpush3.bf16.msra.mxu0 %v2140_v60 }
 0x8a4   : > { %2035 = vmatprep.subr.bf16.mxu0 %v2334_v4  ;;  %2028 = vmatpush3.bf16.msra.mxu1 %v2141_v9 }
 0x8a5   : > { %2029 = vmatprep.subr.bf16.mxu1 %v2334_v4 }
 0x8a8   : > { %2030 = vmatpush3.bf16.msra.mxu1 %v2142_v10 }
 0x971   : > { %v1280_v61 = vpop.f32.mrb[12].mxu0 }
 0x972   : > { %v2011_v62 = vpop.f32.mrb[13].mxu0 }
 0x973   : > { %v1283_v63 = vpop.f32.mrb[14].mxu0 }
 0x974   : > { %v2012_v0 = vpop.f32.mrb[15].mxu0 }
 0x975   : > { %v1329_v1 = vpop.f32.mrb[28].mxu1 }
 0x976   : > { %v1337_v2 = vpack.c.bf16 %v1329_v1, %v1280_v61  ;;  %v2017_v3 = vpop.f32.mrb[29].mxu1 }
 0x977   : > { %v1332_v5 = vpop.f32.mrb[30].mxu1 }
 0x978   : > { %v2018_v8 = vpop.f32.mrb[31].mxu1  ;;  %2024 = vmatmul.mubr.msk.bf16.vlgmr.msra.gmra.mrb[16].mxu0 %vm653_vm2, %v1337_v2 }
 0x979   : > { %2051 = vmatprep.mubr.msk.bf16.mxu0 %vm2335_vm1, %v2334_v4  ;;  %2036 = vmatpush3.bf16.msra.mxu0 %v2143_v11 }
 0x97a   : > { %2037 = vmatprep.subr.bf16.mxu0 %v2334_v4 }
 0x97d   : > { %2038 = vmatpush3.bf16.msra.mxu0 %v2144_v14 }
 0x97e   : > { %2039 = vmatprep.subr.bf16.mxu0 %v2334_v4 }
 0x981   : > { %2040 = vmatpush3.bf16.msra.mxu0 %v2145_v6  ;;  %v1879_v6 = vld [vmem:[%s2876_s14] ss:$0 sm:$0xff] (!%p1878_p11) }
 0x982   : > { %2041 = vmatprep.subr.bf16.mxu0 %v2334_v4 }
 0x985   : > { %2042 = vmatpush3.bf16.msra.mxu0 %v2146_v15 }
 0x986   : > { %2043 = vmatprep.subr.bf16.mxu0 %v2334_v4 }
 0x989   : > { %2044 = vmatpush3.bf16.msra.mxu0 %v2147_v16 }
 0x98a   : > { %2045 = vmatprep.subr.bf16.mxu0 %v2334_v4 }
 0x98d   : > { %2046 = vmatpush3.bf16.msra.mxu0 %v2148_v17  ;;  %v1880_v17 = vld [vmem:[%s2877_s17] ss:$0 sm:$0xff] (!%p1878_p11) }
 0x98e   : > { %2047 = vmatprep.subr.bf16.mxu0 %v2334_v4 }
 0x991   : > { %2048 = vmatpush3.bf16.msra.mxu0 %v2149_v26 }
 0x992   : > { %2049 = vmatprep.subr.bf16.mxu0 %v2334_v4  ;;  %v1869_v4 = vld [vmem:[%s621_s1] ss:$0 sm:$0xff] }
 0xa4b   : > { %v1391_v7 = vpop.f32.mrb[16].mxu0 }
 0xa4c   : > { %v1398_v18 = vadd.f32 %v1391_v7, %v2695_v12  ;;  %v2025_v19 = vpop.f32.mrb[17].mxu0  ;;  %v2150_v12 = vld [vmem:[%s2622_s25 + $0x38] sm:$0xff]  }
 0xa4d   : > { %v1394_v20 = vpop.f32.mrb[18].mxu0  ;;  %2050 = vmatpush3.bf16.msra.mxu0 %v2150_v12 }
 0xa4e   : > { %1400 = vst.msk [vmem:[#allocation2] sm:$0xff] %vm653_vm2, %v1398_v18  ;;  %v1399_v21 = vadd.f32 %v1394_v20, %v2697_v13  ;;  %v2026_v22 = vpop.f32.mrb[19].mxu0  ;;  %v1865_v13 = vld [vmem:[%s2874_s12] ss:$0 sm:$0xff] }
 0xa50   : > { %1401 = vst.msk [vmem:[#allocation2 + $0x8] sm:$0xff] %vm653_vm2, %v1399_v21 }
 0xa55   : > { %v1402_v23 = vld [vmem:[#allocation2] sm:$0xff] }
 0xa57   : > { %v1403_v24 = vld [vmem:[#allocation2 + $0x8] sm:$0xff] }
 0xa58   : > { %v1404_v25 = vpack.c.bf16 %v1403_v24, %v1402_v23 }
 0xa5a   : > { %2032 = vmatmul.mubr.msk.bf16.vlgmr.msra.gmra.mrb[32].mxu1 %vm653_vm2, %v1404_v25 }
 0xb2d   : > { %v1465_v27 = vpop.f32.mrb[32].mxu1 }
 0xb2e   : > { %v1466_v28 = vadd.f32 %v1865_v13, %v1465_v27  ;;  %v2033_v29 = vpop.f32.mrb[33].mxu1 }
 0xb2f   : > { %v1468_v30 = vpop.f32.mrb[34].mxu1 }
 0xb30   : > { %v1469_v31 = vadd.f32 %v1865_v13, %v1468_v30  ;;  %v2034_v32 = vpop.f32.mrb[35].mxu1  ;;  %v1472_v33 = vmax.f32 %v1466_v28, 0.0 }
 0xb32   : > { %v1473_v34 = vmax.f32 %v1469_v31, 0.0 }
 0xb34   : > { %v1474_v35 = vpack.c.bf16 %v1473_v34, %v1472_v33 }
 0xb36   : > { %2052 = vmatmul.mubr.bf16.vlgmr.msra.gmra.mrb[20].mxu0 %v1474_v35 }
 0xc09   : > { %v1580_v36 = vpop.f32.mrb[20].mxu0 }
 0xc0a   : > { %v1581_v37 = vadd.f32 %v1869_v4, %v1580_v36  ;;  %v2053_v38 = vpop.f32.mrb[21].mxu0  ;;  %1594 = sbr.rel (%p1878_p11) target bundleno = 3137 (0xc41), region = 92 }
 0xc0b   : > { %v1583_v39 = vpop.f32.mrb[22].mxu0 }
 0xc0c   : > { %v1587_v40 = vadd.f32 %v1581_v37, %v1402_v23  ;;  %v1584_v41 = vadd.f32 %v1869_v4, %v1583_v39  ;;  %v2054_v42 = vpop.f32.mrb[23].mxu0 }
 0xc0e   : > { %1589 = vst.msk [vmem:[#allocation2] sm:$0xff] %vm653_vm2, %v1587_v40  ;;  %v1588_v43 = vadd.f32 %v1584_v41, %v1403_v24 }
 0xc10   : > { %1590 = vst.msk [vmem:[#allocation2 + $0x8] sm:$0xff] %vm653_vm2, %v1588_v43 }
 0xc15   : > { %v1595_v44 = vld [vmem:[#allocation2] sm:$0xff] }
 0xc16   : > { %v1597_v46 = vsel %vm653_vm2, %v1595_v44, 0.0  ;;  %v1608_v48 = vmul.f32 %v1595_v44, %v1595_v44 }
 0xc17   : > { %v1596_v45 = vld [vmem:[#allocation2 + $0x8] sm:$0xff] }
 0xc18   : > { %v1598_v47 = vsel %vm653_vm2, %v1596_v45, 0.0  ;;  %v1609_v49 = vmul.f32 %v1596_v45, %v1596_v45  ;;  %v1610_v51 = vsel %vm653_vm2, %v1608_v48, 0.0 }
 0xc19   : > { %v1599_v50 = vadd.f32 %v1598_v47, %v1597_v46 }
 0xc1a   : > { %v1611_v52 = vsel %vm653_vm2, %v1609_v49, 0.0 }
 0xc1b   : > { %v1600_v53 = vrot.slane %v1599_v50, 4  ;;  %v1612_v54 = vadd.f32 %v1611_v52, %v1610_v51 }
 0xc1d   : > { %v1601_v55 = vadd.f32 %v1600_v53, %v1599_v50  ;;  %v1613_v56 = vrot.slane %v1612_v54, 4 }
 0xc1f   : > { %v1602_v57 = vrot.slane %v1601_v55, 2  ;;  %v1614_v58 = vadd.f32 %v1613_v56, %v1612_v54 }
 0xc21   : > { %v1603_v59 = vadd.f32 %v1602_v57, %v1601_v55  ;;  %v1615_v60 = vrot.slane %v1614_v58, 2 }
 0xc23   : > { %v1604_v61 = vrot.slane %v1603_v59, 1  ;;  %v1616_v62 = vadd.f32 %v1615_v60, %v1614_v58 }
 0xc25   : > { %v1605_v63 = vadd.f32 %v1604_v61, %v1603_v59  ;;  %v1617_v0 = vrot.slane %v1616_v62, 1 }
 0xc27   : > { %v1607_v1 = vmul.f32 0.0625, %v1605_v63  ;;  %v1618_v2 = vadd.f32 %v1617_v0, %v1616_v62 }
 0xc29   : > { %v1619_v3 = vmul.f32 0.0625, %v1618_v2  ;;  %v1620_v5 = vmul.f32 %v1607_v1, %v1607_v1  ;;  %v1624_v10 = vsub.f32 %v1595_v44, %v1607_v1  ;;  %v1625_v11 = vsub.f32 %v1596_v45, %v1607_v1 }
 0xc2b   : > { %v1621_v8 = vsub.f32 %v1619_v3, %v1620_v5 }
 0xc2d   : > { %v1622_v9 = vadd.f32 1e-05, %v1621_v8 }
 0xc2f   : > { %2167 = vrsqrt.f32 %v1622_v9 }
 0xc39   : > { %v2168_v14 = vpop.eup %2167 }
 0xc3a   : > { %v1626_v15 = vmul.f32 %v2168_v14, %v1624_v10  ;;  %v1627_v16 = vmul.f32 %v2168_v14, %v1625_v11 }
 0xc3c   : > { %v1635_v7 = vmul.f32 %v1879_v6, %v1626_v15  ;;  %v1636_v18 = vmul.f32 %v1879_v6, %v1627_v16 }
 0xc3e   : > { %v1644_v19 = vadd.f32 %v1880_v17, %v1635_v7  ;;  %v1645_v20 = vadd.f32 %v1880_v17, %v1636_v18 }
 0xc40   : > { %1646 = vst.msk [vmem:[#allocation9] sm:$0xff] %vm653_vm2, %v1644_v19  ;;  %1647 = vst.msk [vmem:[#allocation9 + $0x8] sm:$0xff] %vm653_vm2, %v1645_v20 }
 0xc41 PF: > { %p2085_p13 = scmp.eq.s32.totalorder %s2430_s29, 1  ;;  %s2338_s28 = smov [#allocation9]  }
 0xc42   : > { %s1654_s20 = sshll.u32 %s2338_s28, 4  ;;  %s1655_s20 = int_to_ptr.vmem [resolvable:$true] %s1654_s20 }
 0xc43   : > { %s2255_s18 = scalar_lea.vmem %s1655_s20, 256  ;;  %p2262_p0 = scmp.lt.s32.totalorder %s1655_s20, %s1655_s20 }
 0xc44   : > { %p2256_p12 = scmp.ne.s32.totalorder %s1655_s20, %s2255_s18  ;;  %p2263_p5 = scmp.lt.s32.totalorder %s2255_s18, %s2255_s18 }
 0xc46   : > { %p2257_p8 = pnand %p2256_p12, %p2085_p13  ;;  %p2264_p9 = por %p2263_p5, %p2262_p0 }
 0xc48   : > { %p2258_p10 = pneg %p2257_p8 }
 0xc4a   : > { %p2265_p1 = pnand %p2264_p9, %p2258_p10 }
 0xc4c   : > { %2268 = shalt.err (!%p2265_p1)
}
 0xc4d   : > { %s2878_s11 = sld [smem:[#allocation23_spill]] }
 0xc53   : > { %s2269_s0 = scalar_lea.hbm %s2878_s11, 256 }
 0xc54   : > { %p2270_p3 = scmp.ne.s32.totalorder %s2878_s11, %s2269_s0  ;;  %p2275_p4 = scmp.lt.u32.totalorder %s2269_s0, %s2878_s11 }
 0xc56   : > { %p2271_p6 = pnand %p2270_p3, %p2085_p13 }
 0xc58   : > { %p2272_p2 = pneg %p2271_p6 }
 0xc5a   : > { %p2277_p7 = pnand %p2275_p4, %p2272_p2 }
 0xc5c   : > { %2280 = shalt.err (!%p2277_p7)
}
 0xc5d   : > { %s2339_s10 = smov 128   ;;  %s2340_s12 = smov 8  }
 0xc5e   : > { %2066 = dma.vmem_to_hbm [thread:$0]  (%p2085_p13), %s1655_s20, 256, %s2878_s11, [#allocation5], %s2339_s10, %s2339_s10, %s2340_s12  }
 0xc5f   : > { %2310 = dma.done.wait (%p2085_p13), [#allocation5], 256  }
 0xc60   : > { %2312 = vsyncadd (%p2085_p13), [#allocation5], 4294967040 }
 0xc61 PF: > { %s2879_s28 = sld [smem:[#allocation14_spill]]  ;;  %s2880_s24 = sld [smem:[#allocation15_spill]] }
 0xc62   : > { %s2881_s25 = smov %s2319_s26  ;;  %s2882_s26 = smov %s2323_s27 }
 0xc67   : > { %p23_p11 = scmp.ge.s32.totalorder %s2879_s28, 4   ;;  %s2883_s27 = smov %s2880_s24 }
 0xc69   :  { %25 = sbr.rel (!%p23_p11) target bundleno = 13 (0xd), region = 148 }
 0xc70   :  { %1670 = vsyncpa [#allocation4], 1 }
 0xc71   :  { %1672 = vsyncpa [#allocation4 + $0x1], 1 }
 0xc72   :  { %1673 = vsyncpa [#allocation7], 1 }
 0xc73   :  { %1674 = vsyncpa [#allocation5], 1 }
 0xc74   :  { %1676 = vsyncpa [#allocation5 + $0x1], 1 }

</bundles_post_ra>
